<compile_context>
chip_gen: v7x
topology: tpu7x:2x2x1
jax: 0.10.0
libtpu: 0.0.40
codegen_flags: <defaults>
</compile_context>

<pallas_src>
from functools import partial

import numpy as np

import jax
import jax.numpy as jnp
from jax.experimental import pallas as pl
from jax.experimental.pallas import tpu as pltpu


def conv1d_block_kernel(x_ref, w1_ref, pv_ref, alpha_ref, wout_ref, bout_ref,
                        sc_ref, out_ref, pad_buf,
                        *, K, dilation, pad, eps, cin):
    # Packed per-channel params (pv_ref rows): [0..K-1]=wd taps, K=b1, K+1=g1,
    # K+2=be1, K+3=bd, K+4=g2, K+5=be2.
    x = x_ref[0]                       # (T, Cin) f32
    T = x.shape[0]
    n = float(x.shape[0] * pv_ref.shape[1])   # T * Cout (static)

    # ---- 1x1 conv on the MXU: bf16 inputs, f32 accumulation ---------------------
    c = jnp.dot(x.astype(jnp.bfloat16), w1_ref[...],
                preferred_element_type=jnp.float32) + pv_ref[K, :]        # + b1

    # ---- PReLU 1 (single shared alpha, read from SMEM) --------------------------
    a1 = alpha_ref[0]
    c = jnp.where(c >= 0, c, a1 * c)

    # ---- gLN 1: fused stats (sum & sumsq in one pass), folded scale/shift, f32 --
    s1 = jnp.sum(c)
    ss1 = jnp.sum(c * c)
    mean1 = s1 / n
    var1 = ss1 / n - mean1 * mean1
    scale1 = pv_ref[K + 1, :] * jax.lax.rsqrt(var1 + eps)                 # gamma*rsqrt
    shift1 = pv_ref[K + 2, :] - mean1 * scale1                            # beta - mean*scale
    c = c * scale1 + shift1

    # ---- depthwise dilated conv ('same' padding, non-causal) --------------------
    # Only the pad rows are zeroed, once; the scratch persists across grid steps and
    # the pad rows are never overwritten afterwards.
    if pad > 0:
        @pl.when(pl.program_id(0) == 0)
        def _zero_pad_rows():
            z = jnp.zeros((pad, c.shape[1]), jnp.float32)
            pad_buf[pl.ds(0, pad), :] = z
            pad_buf[pl.ds(pad + T, pad), :] = z

    pad_buf[pl.ds(pad, T), :] = c
    acc = pad_buf[pl.ds(0, T), :] * pv_ref[0, :]
    for k in range(1, K):                           # static unroll over taps
        acc = acc + pad_buf[pl.ds(k * dilation, T), :] * pv_ref[k, :]
    c = acc + pv_ref[K + 3, :]                      # + bd

    # ---- PReLU 2 -----------------------------------------------------------------
    a2 = alpha_ref[1]
    c = jnp.where(c >= 0, c, a2 * c)

    # ---- gLN 2: fused stats, f32 ---------------------------------------------------
    s2 = jnp.sum(c)
    ss2 = jnp.sum(c * c)
    mean2 = s2 / n
    var2 = ss2 / n - mean2 * mean2
    scale2 = pv_ref[K + 4, :] * jax.lax.rsqrt(var2 + eps)
    shift2 = pv_ref[K + 5, :] - mean2 * scale2
    c = c * scale2 + shift2

    # ---- merged skip + output 1x1 conv: one MXU call, lane-dense (T, 2*Cin) ------
    y = jnp.dot(c.astype(jnp.bfloat16), wout_ref[...],
                preferred_element_type=jnp.float32) + bout_ref[...]       # (T, 2*Cin)
    sc_ref[0] = y[:, :cin]
    out_ref[0] = y[:, cin:] + x                     # residual add stays in f32


def conv1d_block(x_nct, params, *, kernel_size, dilation, eps=1e-5):
    """x_nct: (B, Cin, T) float32. Returns (Sc, out), each (B, Cin, T) float32."""
    B, Cin, T = x_nct.shape
    Cout = params["w1"].shape[1]
    assert kernel_size % 2 == 1, "non-causal 'same' padding assumes odd kernel_size"
    pad = dilation * (kernel_size - 1) // 2
    K = kernel_size

    # (B, T, Cin) channels-last for the kernel.  (For production Cin, keeping NCT and
    # lane-rolling over T would remove these transposes entirely.)
    x = jnp.transpose(x_nct, (0, 2, 1))

    # MXU weights in bf16; elementwise params stay f32.
    w1_bf16 = params["w1"].astype(jnp.bfloat16)                               # (Cin, Cout)
    wout_bf16 = jnp.concatenate([params["wsc"], params["wo"]],
                                axis=1).astype(jnp.bfloat16)                  # (Cout, 2*Cin)
    bout = jnp.concatenate([params["bsc"], params["bo"]], axis=1)             # (1, 2*Cin)
    pv = jnp.concatenate([params["wd"],                                       # (K, Cout)
                          params["b1"], params["g1"], params["be1"],
                          params["bd"], params["g2"], params["be2"]], axis=0) # (K+6, Cout)
    alphas = jnp.concatenate([params["a1"].reshape(-1),
                              params["a2"].reshape(-1)])                      # (2,)

    def full2d(shape):
        return pl.BlockSpec(shape, lambda b: (0, 0))

    in_specs = [
        pl.BlockSpec((1, T, Cin), lambda b: (b, 0, 0)),                 # x (f32)
        full2d((Cin, Cout)),                                            # w1 (bf16)
        full2d((K + 6, Cout)),                                          # packed vectors (f32)
        pl.BlockSpec(memory_space=pltpu.MemorySpace.SMEM),              # PReLU alphas
        full2d((Cout, 2 * Cin)),                                        # [wsc | wo] (bf16)
        full2d((1, 2 * Cin)),                                           # [bsc | bo]
    ]
    out_specs = (pl.BlockSpec((1, T, Cin), lambda b: (b, 0, 0)),
                 pl.BlockSpec((1, T, Cin), lambda b: (b, 0, 0)))
    out_shape = (jax.ShapeDtypeStruct((B, T, Cin), jnp.float32),
                 jax.ShapeDtypeStruct((B, T, Cin), jnp.float32))

    kernel = partial(conv1d_block_kernel, K=K, dilation=dilation, pad=pad,
                     eps=eps, cin=Cin)

    sc, out = pl.pallas_call(
        kernel,
        out_shape=out_shape,
        grid_spec=pltpu.PrefetchScalarGridSpec(
            num_scalar_prefetch=0,
            grid=(B,),
            in_specs=in_specs,
            out_specs=out_specs,
            scratch_shapes=[pltpu.VMEM((T + 2 * pad, Cout), jnp.float32)],
        ),
        compiler_params=pltpu.CompilerParams(
            dimension_semantics=("parallel",),      # B shards across v7x TensorCores
            vmem_limit_bytes=32 * 1024 * 1024,      # explicit budget (v7x-safe)
        ),
    )(x, w1_bf16, pv, alphas, wout_bf16, bout)

    # back to PyTorch NCT layout
    return jnp.transpose(sc, (0, 2, 1)), jnp.transpose(out, (0, 2, 1))


def init_params(key, cin, cout, kernel_size):
    """Deterministic synthetic init matching the PyTorch parameter shapes.

    PyTorch shapes -> kernel layout:
      conv1x1.weight (Cout, Cin, 1)  -> w1 (Cin, Cout)   (transposed for x @ W)
      dwconv.weight  (Cout, 1, K)    -> wd (K, Cout)
      Sc_conv.weight (Cin, Cout, 1)  -> wsc (Cout, Cin)
      Output.weight  (Cin, Cout, 1)  -> wo (Cout, Cin)
      PReLU alpha = 0.25 ; gLN gamma = 1, beta = 0
    """
    ks = jax.random.split(key, 8)
    s = 0.1
    return {
        "w1":  s * jax.random.normal(ks[0], (cin, cout), jnp.float32),
        "b1":  s * jax.random.normal(ks[1], (1, cout), jnp.float32),
        "a1":  jnp.full((1, 1), 0.25, jnp.float32),
        "g1":  jnp.ones((1, cout), jnp.float32),
        "be1": jnp.zeros((1, cout), jnp.float32),
        "wd":  s * jax.random.normal(ks[2], (kernel_size, cout), jnp.float32),
        "bd":  s * jax.random.normal(ks[3], (1, cout), jnp.float32),
        "a2":  jnp.full((1, 1), 0.25, jnp.float32),
        "g2":  jnp.ones((1, cout), jnp.float32),
        "be2": jnp.zeros((1, cout), jnp.float32),
        "wsc": s * jax.random.normal(ks[4], (cout, cin), jnp.float32),
        "bsc": s * jax.random.normal(ks[5], (1, cin), jnp.float32),
        "wo":  s * jax.random.normal(ks[6], (cout, cin), jnp.float32),
        "bo":  s * jax.random.normal(ks[7], (1, cin), jnp.float32),
    }


def conv1d_block_reference(x_nct, params, *, kernel_size, dilation, eps=1e-5):
    """Pure-JAX f32 reference implementing the PyTorch forward (non-causal, skip_con)."""
    B, Cin, T = x_nct.shape
    pad = dilation * (kernel_size - 1) // 2
    x = jnp.transpose(x_nct, (0, 2, 1))                                   # (B, T, Cin)
    c = jnp.einsum("btc,cd->btd", x, params["w1"]) + params["b1"]
    a1 = params["a1"].reshape(())
    c = jnp.where(c >= 0, c, a1 * c)
    mean = jnp.mean(c, axis=(1, 2), keepdims=True)
    var = jnp.mean((c - mean) ** 2, axis=(1, 2), keepdims=True)
    c = params["g1"] * (c - mean) / jnp.sqrt(var + eps) + params["be1"]
    cp = jnp.pad(c, ((0, 0), (pad, pad), (0, 0)))
    y = sum(cp[:, k * dilation:k * dilation + T, :] * params["wd"][k]
            for k in range(kernel_size)) + params["bd"]
    a2 = params["a2"].reshape(())
    y = jnp.where(y >= 0, y, a2 * y)
    mean2 = jnp.mean(y, axis=(1, 2), keepdims=True)
    var2 = jnp.mean((y - mean2) ** 2, axis=(1, 2), keepdims=True)
    y = params["g2"] * (y - mean2) / jnp.sqrt(var2 + eps) + params["be2"]
    sc = jnp.einsum("btd,dc->btc", y, params["wsc"]) + params["bsc"]
    out = jnp.einsum("btd,dc->btc", y, params["wo"]) + params["bo"] + x
    return jnp.transpose(sc, (0, 2, 1)), jnp.transpose(out, (0, 2, 1))


if __name__ == "__main__":
    B, Cin, Cout, T = 2, 16, 32, 16
    kernel_size, dilation = 3, 2

    key = jax.random.PRNGKey(0)
    kx, kp = jax.random.split(key)
    x = jax.random.normal(kx, (B, Cin, T), jnp.float32)   # PyTorch NCT layout
    params = init_params(kp, Cin, Cout, kernel_size)

    sc, out = conv1d_block(x, params, kernel_size=kernel_size, dilation=dilation)
    jax.block_until_ready((sc, out))
    assert sc.shape == (B, Cin, T) and out.shape == (B, Cin, T)

    # Numerical check vs. pure-JAX reference (loose tolerance: matmuls run in bf16).
    sc_ref, out_ref = conv1d_block_reference(x, params, kernel_size=kernel_size,
                                             dilation=dilation)
    np.testing.assert_allclose(np.asarray(sc), np.asarray(sc_ref), rtol=3e-2, atol=3e-2)
    np.testing.assert_allclose(np.asarray(out), np.asarray(out_ref), rtol=3e-2, atol=3e-2)

    print("KERNEL_OK")
</pallas_src>

<mosaic_0001>
module attributes {stable_mosaic.version = 11 : i64} {
  func.func @conv1d_block_kernel(%arg0: i32, %arg1: memref<1x16x16xf32, #tpu.memory_space<vmem>>, %arg2: memref<16x32xbf16, #tpu.memory_space<vmem>>, %arg3: memref<9x32xf32, #tpu.memory_space<vmem>>, %arg4: memref<2xf32, #tpu.memory_space<smem>>, %arg5: memref<32x32xbf16, #tpu.memory_space<vmem>>, %arg6: memref<1x32xf32, #tpu.memory_space<vmem>>, %arg7: memref<1x16x16xf32, #tpu.memory_space<vmem>>, %arg8: memref<1x16x16xf32, #tpu.memory_space<vmem>>, %arg9: memref<20x32xf32, #tpu.memory_space<vmem>>) attributes {dimension_semantics = [#tpu.dimension_semantics<parallel>], iteration_bounds = array<i64: 2>, scalar_prefetch = 0 : i64, scratch_operands = 1 : i64, tpu.core_type = #tpu.core_type<tc>, window_params = [{transform_indices = @transform_0, window_bounds = array<i64: 1, 16, 16>}, {pipeline_mode = #tpu.pipeline_mode<synchronous>, transform_indices = @transform_1, window_bounds = array<i64: 16, 32>}, {pipeline_mode = #tpu.pipeline_mode<synchronous>, transform_indices = @transform_2, window_bounds = array<i64: 9, 32>}, {transform_indices = @transform_3, window_bounds = array<i64: 2>}, {pipeline_mode = #tpu.pipeline_mode<synchronous>, transform_indices = @transform_4, window_bounds = array<i64: 32, 32>}, {pipeline_mode = #tpu.pipeline_mode<synchronous>, transform_indices = @transform_5, window_bounds = array<i64: 1, 32>}, {transform_indices = @transform_6, window_bounds = array<i64: 1, 16, 16>}, {transform_indices = @transform_7, window_bounds = array<i64: 1, 16, 16>}]} {
    %c0 = arith.constant 0 : index
    %c0_0 = arith.constant 0 : index
    %c0_1 = arith.constant 0 : index
    %0 = vector.load %arg1[%c0, %c0_0, %c0_1] : memref<1x16x16xf32, #tpu.memory_space<vmem>>, vector<1x16x16xf32>
    %1 = vector.shape_cast %0 : vector<1x16x16xf32> to vector<16x16xf32>
    %2 = arith.truncf %1 : vector<16x16xf32> to vector<16x16xbf16>
    %c0_2 = arith.constant 0 : index
    %c0_3 = arith.constant 0 : index
    %3 = vector.load %arg2[%c0_2, %c0_3] : memref<16x32xbf16, #tpu.memory_space<vmem>>, vector<16x32xbf16>
    %cst = arith.constant dense<0.000000e+00> : vector<16x32xf32>
    %4 = tpu.matmul %2, %3, %cst {dimension_numbers = #tpu.dot_dimension_numbers<[1], [0], [0], [1], [0, 0, 1, 1], [], []>} : vector<16x16xbf16>, vector<16x32xbf16>, vector<16x32xf32> -> vector<16x32xf32>
    %c3 = arith.constant 3 : index
    %c0_4 = arith.constant 0 : index
    %5 = vector.load %arg3[%c3, %c0_4] : memref<9x32xf32, #tpu.memory_space<vmem>>, vector<1x32xf32>
    %6 = vector.shape_cast %5 : vector<1x32xf32> to vector<32xf32>
    %7 = vector.shape_cast %6 : vector<32xf32> to vector<1x32xf32>
    %8 = vector.broadcast %7 : vector<1x32xf32> to vector<16x32xf32>
    %9 = arith.addf %4, %8 : vector<16x32xf32>
    %c0_5 = arith.constant 0 : index
    %10 = memref.load %arg4[%c0_5] : memref<2xf32, #tpu.memory_space<smem>>
    %cst_6 = arith.constant 0.000000e+00 : f32
    %11 = vector.broadcast %cst_6 : f32 to vector<16x32xf32>
    %12 = arith.cmpf oge, %9, %11 : vector<16x32xf32>
    %13 = vector.broadcast %10 : f32 to vector<16x32xf32>
    %14 = arith.mulf %13, %9 : vector<16x32xf32>
    %15 = arith.select %12, %9, %14 : vector<16x32xi1>, vector<16x32xf32>
    %16 = vector.shape_cast %15 : vector<16x32xf32> to vector<1x16x32xf32>
    %cst_7 = arith.constant dense<0.000000e+00> : vector<1xf32>
    %17 = vector.multi_reduction <add>, %16, %cst_7 [1, 2] : vector<1x16x32xf32> to vector<1xf32>
    %18 = vector.shape_cast %17 : vector<1xf32> to vector<1x1x1xf32>
    %19 = vector.extract %18[0, 0, 0] : f32 from vector<1x1x1xf32>
    %20 = arith.mulf %15, %15 : vector<16x32xf32>
    %21 = vector.shape_cast %20 : vector<16x32xf32> to vector<1x16x32xf32>
    %cst_8 = arith.constant dense<0.000000e+00> : vector<1xf32>
    %22 = vector.multi_reduction <add>, %21, %cst_8 [1, 2] : vector<1x16x32xf32> to vector<1xf32>
    %23 = vector.shape_cast %22 : vector<1xf32> to vector<1x1x1xf32>
    %24 = vector.extract %23[0, 0, 0] : f32 from vector<1x1x1xf32>
    %cst_9 = arith.constant 5.120000e+02 : f32
    %25 = arith.divf %19, %cst_9 : f32
    %cst_10 = arith.constant 5.120000e+02 : f32
    %26 = arith.divf %24, %cst_10 : f32
    %27 = arith.mulf %25, %25 : f32
    %28 = arith.subf %26, %27 : f32
    %c4 = arith.constant 4 : index
    %c0_11 = arith.constant 0 : index
    %29 = vector.load %arg3[%c4, %c0_11] : memref<9x32xf32, #tpu.memory_space<vmem>>, vector<1x32xf32>
    %30 = vector.shape_cast %29 : vector<1x32xf32> to vector<32xf32>
    %cst_12 = arith.constant 9.99999974E-6 : f32
    %31 = arith.addf %28, %cst_12 : f32
    %32 = math.rsqrt %31 : f32
    %33 = vector.broadcast %32 : f32 to vector<32xf32>
    %34 = arith.mulf %30, %33 : vector<32xf32>
    %c5 = arith.constant 5 : index
    %c0_13 = arith.constant 0 : index
    %35 = vector.load %arg3[%c5, %c0_13] : memref<9x32xf32, #tpu.memory_space<vmem>>, vector<1x32xf32>
    %36 = vector.shape_cast %35 : vector<1x32xf32> to vector<32xf32>
    %37 = vector.broadcast %25 : f32 to vector<32xf32>
    %38 = arith.mulf %37, %34 : vector<32xf32>
    %39 = arith.subf %36, %38 : vector<32xf32>
    %40 = vector.shape_cast %34 : vector<32xf32> to vector<1x32xf32>
    %41 = vector.broadcast %40 : vector<1x32xf32> to vector<16x32xf32>
    %42 = arith.mulf %15, %41 : vector<16x32xf32>
    %43 = vector.shape_cast %39 : vector<32xf32> to vector<1x32xf32>
    %44 = vector.broadcast %43 : vector<1x32xf32> to vector<16x32xf32>
    %45 = arith.addf %42, %44 : vector<16x32xf32>
    %c0_i32 = arith.constant 0 : i32
    %46 = arith.cmpi eq, %arg0, %c0_i32 : i32
    %47 = arith.extui %46 : i1 to i32
    %c0_i32_14 = arith.constant 0 : i32
    %48 = arith.cmpi ne, %47, %c0_i32_14 : i32
    scf.if %48 {
      %cst_48 = arith.constant 0.000000e+00 : f32
      %126 = vector.broadcast %cst_48 : f32 to vector<2x32xf32>
      %c0_49 = arith.constant 0 : index
      %c0_50 = arith.constant 0 : index
      %127 = vector.load %arg9[%c0_49, %c0_50] : memref<20x32xf32, #tpu.memory_space<vmem>>, vector<2x32xf32>
      tpu.vector_store %arg9[%c0_49, %c0_50], %126 {strides = array<i32>} : memref<20x32xf32, #tpu.memory_space<vmem>>, vector<2x32xf32>,
      %c18 = arith.constant 18 : index
      %c0_51 = arith.constant 0 : index
      %128 = vector.load %arg9[%c18, %c0_51] : memref<20x32xf32, #tpu.memory_space<vmem>>, vector<2x32xf32>
      tpu.vector_store %arg9[%c18, %c0_51], %126 {strides = array<i32>} : memref<20x32xf32, #tpu.memory_space<vmem>>, vector<2x32xf32>,
    } else {
    }
    %c2 = arith.constant 2 : index
    %c0_15 = arith.constant 0 : index
    %49 = vector.load %arg9[%c2, %c0_15] : memref<20x32xf32, #tpu.memory_space<vmem>>, vector<16x32xf32>
    tpu.vector_store %arg9[%c2, %c0_15], %45 {strides = array<i32>} : memref<20x32xf32, #tpu.memory_space<vmem>>, vector<16x32xf32>,
    %c0_16 = arith.constant 0 : index
    %c0_17 = arith.constant 0 : index
    %50 = vector.load %arg9[%c0_16, %c0_17] : memref<20x32xf32, #tpu.memory_space<vmem>>, vector<16x32xf32>
    %c0_18 = arith.constant 0 : index
    %c0_19 = arith.constant 0 : index
    %51 = vector.load %arg3[%c0_18, %c0_19] : memref<9x32xf32, #tpu.memory_space<vmem>>, vector<1x32xf32>
    %52 = vector.shape_cast %51 : vector<1x32xf32> to vector<32xf32>
    %53 = vector.shape_cast %52 : vector<32xf32> to vector<1x32xf32>
    %54 = vector.broadcast %53 : vector<1x32xf32> to vector<16x32xf32>
    %55 = arith.mulf %50, %54 : vector<16x32xf32>
    %c2_20 = arith.constant 2 : index
    %c0_21 = arith.constant 0 : index
    %56 = vector.load %arg9[%c2_20, %c0_21] : memref<20x32xf32, #tpu.memory_space<vmem>>, vector<16x32xf32>
    %c1 = arith.constant 1 : index
    %c0_22 = arith.constant 0 : index
    %57 = vector.load %arg3[%c1, %c0_22] : memref<9x32xf32, #tpu.memory_space<vmem>>, vector<1x32xf32>
    %58 = vector.shape_cast %57 : vector<1x32xf32> to vector<32xf32>
    %59 = vector.shape_cast %58 : vector<32xf32> to vector<1x32xf32>
    %60 = vector.broadcast %59 : vector<1x32xf32> to vector<16x32xf32>
    %61 = arith.mulf %56, %60 : vector<16x32xf32>
    %62 = arith.addf %55, %61 : vector<16x32xf32>
    %c4_23 = arith.constant 4 : index
    %c0_24 = arith.constant 0 : index
    %63 = vector.load %arg9[%c4_23, %c0_24] : memref<20x32xf32, #tpu.memory_space<vmem>>, vector<16x32xf32>
    %c2_25 = arith.constant 2 : index
    %c0_26 = arith.constant 0 : index
    %64 = vector.load %arg3[%c2_25, %c0_26] : memref<9x32xf32, #tpu.memory_space<vmem>>, vector<1x32xf32>
    %65 = vector.shape_cast %64 : vector<1x32xf32> to vector<32xf32>
    %66 = vector.shape_cast %65 : vector<32xf32> to vector<1x32xf32>
    %67 = vector.broadcast %66 : vector<1x32xf32> to vector<16x32xf32>
    %68 = arith.mulf %63, %67 : vector<16x32xf32>
    %69 = arith.addf %62, %68 : vector<16x32xf32>
    %c6 = arith.constant 6 : index
    %c0_27 = arith.constant 0 : index
    %70 = vector.load %arg3[%c6, %c0_27] : memref<9x32xf32, #tpu.memory_space<vmem>>, vector<1x32xf32>
    %71 = vector.shape_cast %70 : vector<1x32xf32> to vector<32xf32>
    %72 = vector.shape_cast %71 : vector<32xf32> to vector<1x32xf32>
    %73 = vector.broadcast %72 : vector<1x32xf32> to vector<16x32xf32>
    %74 = arith.addf %69, %73 : vector<16x32xf32>
    %c1_28 = arith.constant 1 : index
    %75 = memref.load %arg4[%c1_28] : memref<2xf32, #tpu.memory_space<smem>>
    %cst_29 = arith.constant 0.000000e+00 : f32
    %76 = vector.broadcast %cst_29 : f32 to vector<16x32xf32>
    %77 = arith.cmpf oge, %74, %76 : vector<16x32xf32>
    %78 = vector.broadcast %75 : f32 to vector<16x32xf32>
    %79 = arith.mulf %78, %74 : vector<16x32xf32>
    %80 = arith.select %77, %74, %79 : vector<16x32xi1>, vector<16x32xf32>
    %81 = vector.shape_cast %80 : vector<16x32xf32> to vector<1x16x32xf32>
    %cst_30 = arith.constant dense<0.000000e+00> : vector<1xf32>
    %82 = vector.multi_reduction <add>, %81, %cst_30 [1, 2] : vector<1x16x32xf32> to vector<1xf32>
    %83 = vector.shape_cast %82 : vector<1xf32> to vector<1x1x1xf32>
    %84 = vector.extract %83[0, 0, 0] : f32 from vector<1x1x1xf32>
    %85 = arith.mulf %80, %80 : vector<16x32xf32>
    %86 = vector.shape_cast %85 : vector<16x32xf32> to vector<1x16x32xf32>
    %cst_31 = arith.constant dense<0.000000e+00> : vector<1xf32>
    %87 = vector.multi_reduction <add>, %86, %cst_31 [1, 2] : vector<1x16x32xf32> to vector<1xf32>
    %88 = vector.shape_cast %87 : vector<1xf32> to vector<1x1x1xf32>
    %89 = vector.extract %88[0, 0, 0] : f32 from vector<1x1x1xf32>
    %cst_32 = arith.constant 5.120000e+02 : f32
    %90 = arith.divf %84, %cst_32 : f32
    %cst_33 = arith.constant 5.120000e+02 : f32
    %91 = arith.divf %89, %cst_33 : f32
    %92 = arith.mulf %90, %90 : f32
    %93 = arith.subf %91, %92 : f32
    %c7 = arith.constant 7 : index
    %c0_34 = arith.constant 0 : index
    %94 = vector.load %arg3[%c7, %c0_34] : memref<9x32xf32, #tpu.memory_space<vmem>>, vector<1x32xf32>
    %95 = vector.shape_cast %94 : vector<1x32xf32> to vector<32xf32>
    %cst_35 = arith.constant 9.99999974E-6 : f32
    %96 = arith.addf %93, %cst_35 : f32
    %97 = math.rsqrt %96 : f32
    %98 = vector.broadcast %97 : f32 to vector<32xf32>
    %99 = arith.mulf %95, %98 : vector<32xf32>
    %c8 = arith.constant 8 : index
    %c0_36 = arith.constant 0 : index
    %100 = vector.load %arg3[%c8, %c0_36] : memref<9x32xf32, #tpu.memory_space<vmem>>, vector<1x32xf32>
    %101 = vector.shape_cast %100 : vector<1x32xf32> to vector<32xf32>
    %102 = vector.broadcast %90 : f32 to vector<32xf32>
    %103 = arith.mulf %102, %99 : vector<32xf32>
    %104 = arith.subf %101, %103 : vector<32xf32>
    %105 = vector.shape_cast %99 : vector<32xf32> to vector<1x32xf32>
    %106 = vector.broadcast %105 : vector<1x32xf32> to vector<16x32xf32>
    %107 = arith.mulf %80, %106 : vector<16x32xf32>
    %108 = vector.shape_cast %104 : vector<32xf32> to vector<1x32xf32>
    %109 = vector.broadcast %108 : vector<1x32xf32> to vector<16x32xf32>
    %110 = arith.addf %107, %109 : vector<16x32xf32>
    %111 = arith.truncf %110 : vector<16x32xf32> to vector<16x32xbf16>
    %c0_37 = arith.constant 0 : index
    %c0_38 = arith.constant 0 : index
    %112 = vector.load %arg5[%c0_37, %c0_38] : memref<32x32xbf16, #tpu.memory_space<vmem>>, vector<32x32xbf16>
    %cst_39 = arith.constant dense<0.000000e+00> : vector<16x32xf32>
    %113 = tpu.matmul %111, %112, %cst_39 {dimension_numbers = #tpu.dot_dimension_numbers<[1], [0], [0], [1], [0, 0, 1, 1], [], []>} : vector<16x32xbf16>, vector<32x32xbf16>, vector<16x32xf32> -> vector<16x32xf32>
    %c0_40 = arith.constant 0 : index
    %c0_41 = arith.constant 0 : index
    %114 = vector.load %arg6[%c0_40, %c0_41] : memref<1x32xf32, #tpu.memory_space<vmem>>, vector<1x32xf32>
    %115 = vector.broadcast %114 : vector<1x32xf32> to vector<16x32xf32>
    %116 = arith.addf %113, %115 : vector<16x32xf32>
    %117 = vector.extract_strided_slice %116 {offsets = [0, 0], sizes = [16, 16], strides = [1, 1]} : vector<16x32xf32> to vector<16x16xf32>
    %c0_42 = arith.constant 0 : index
    %c0_43 = arith.constant 0 : index
    %c0_44 = arith.constant 0 : index
    %118 = vector.load %arg7[%c0_42, %c0_43, %c0_44] : memref<1x16x16xf32, #tpu.memory_space<vmem>>, vector<1x16x16xf32>
    %119 = vector.shape_cast %118 : vector<1x16x16xf32> to vector<16x16xf32>
    %120 = vector.shape_cast %117 : vector<16x16xf32> to vector<1x16x16xf32>
    tpu.vector_store %arg7[%c0_42, %c0_43, %c0_44], %120 {strides = array<i32>} : memref<1x16x16xf32, #tpu.memory_space<vmem>>, vector<1x16x16xf32>,
    %121 = vector.extract_strided_slice %116 {offsets = [0, 16], sizes = [16, 16], strides = [1, 1]} : vector<16x32xf32> to vector<16x16xf32>
    %122 = arith.addf %121, %1 : vector<16x16xf32>
    %c0_45 = arith.constant 0 : index
    %c0_46 = arith.constant 0 : index
    %c0_47 = arith.constant 0 : index
    %123 = vector.load %arg8[%c0_45, %c0_46, %c0_47] : memref<1x16x16xf32, #tpu.memory_space<vmem>>, vector<1x16x16xf32>
    %124 = vector.shape_cast %123 : vector<1x16x16xf32> to vector<16x16xf32>
    %125 = vector.shape_cast %122 : vector<16x16xf32> to vector<1x16x16xf32>
    tpu.vector_store %arg8[%c0_45, %c0_46, %c0_47], %125 {strides = array<i32>} : memref<1x16x16xf32, #tpu.memory_space<vmem>>, vector<1x16x16xf32>,
    return
  }
  func.func @transform_0(%arg0: i32) -> (i32, i32, i32) {
    %c0_i32 = arith.constant 0 : i32
    %c0_i32_0 = arith.constant 0 : i32
    %c0_i32_1 = arith.constant 0 : i32
    return %arg0, %c0_i32, %c0_i32_0 : i32, i32, i32
  }
  func.func @transform_1(%arg0: i32) -> (i32, i32) {
    %c0_i32 = arith.constant 0 : i32
    %c0_i32_0 = arith.constant 0 : i32
    %c0_i32_1 = arith.constant 0 : i32
    return %c0_i32, %c0_i32_0 : i32, i32
  }
  func.func @transform_2(%arg0: i32) -> (i32, i32) {
    %c0_i32 = arith.constant 0 : i32
    %c0_i32_0 = arith.constant 0 : i32
    %c0_i32_1 = arith.constant 0 : i32
    return %c0_i32, %c0_i32_0 : i32, i32
  }
  func.func @transform_3(%arg0: i32) -> i32 {
    %c0_i32 = arith.constant 0 : i32
    %c0_i32_0 = arith.constant 0 : i32
    return %c0_i32 : i32
  }
  func.func @transform_4(%arg0: i32) -> (i32, i32) {
    %c0_i32 = arith.constant 0 : i32
    %c0_i32_0 = arith.constant 0 : i32
    %c0_i32_1 = arith.constant 0 : i32
    return %c0_i32, %c0_i32_0 : i32, i32
  }
  func.func @transform_5(%arg0: i32) -> (i32, i32) {
    %c0_i32 = arith.constant 0 : i32
    %c0_i32_0 = arith.constant 0 : i32
    %c0_i32_1 = arith.constant 0 : i32
    return %c0_i32, %c0_i32_0 : i32, i32
  }
  func.func @transform_6(%arg0: i32) -> (i32, i32, i32) {
    %c0_i32 = arith.constant 0 : i32
    %c0_i32_0 = arith.constant 0 : i32
    %c0_i32_1 = arith.constant 0 : i32
    return %arg0, %c0_i32, %c0_i32_0 : i32, i32, i32
  }
  func.func @transform_7(%arg0: i32) -> (i32, i32, i32) {
    %c0_i32 = arith.constant 0 : i32
    %c0_i32_0 = arith.constant 0 : i32
    %c0_i32_1 = arith.constant 0 : i32
    return %arg0, %c0_i32, %c0_i32_0 : i32, i32, i32
  }
}

</mosaic_0001>

<bundles_post_ra>
// kernel: tpu_custom_call.1
= control target key start
LH: loop header
LB: loop body
LE: loop exit
PB: predicated region body
PF: predicated region fallthrough
CT: control target
= control target key end

     0   :  { %13 = vsyncpa [#allocation4], 0  ;;  %s1739_s0 = inlined_call_operand.hbm [shape: f32[2,16,16], index: 0, kind: input, shape index: {}]   ;;  %s1740_s1 = inlined_call_operand.hbm [shape: bf16[16,32], index: 1, kind: input, shape index: {}]   ;;  %s1741_s2 = inlined_call_operand.hbm [shape: f32[9,32], index: 2, kind: input, shape index: {}]   ;;  %s1742_s3 = inlined_call_operand.vmem [shape: f32[2], index: 3, kind: input, shape index: {}]   ;;  %s1743_s4 = inlined_call_operand.hbm [shape: bf16[32,32], index: 4, kind: input, shape index: {}]   ;;  %s1744_s5 = inlined_call_operand.vmem [shape: f32[1,32], index: 5, kind: input, shape index: {}]   ;;  %s1745_s6 = inlined_call_operand.hbm [shape: f32[2,16,16], index: 6, kind: output, shape index: {0}]   ;;  %s1746_s7 = inlined_call_operand.hbm [shape: f32[2,16,16], index: 7, kind: output, shape index: {1}]  }
   0x1   :  { %15 = vsyncpa [#allocation4 + $0x1], 0 }
   0x2   :  { %16 = vsyncpa [#allocation8], 0 }
   0x3   :  { %17 = vsyncpa [#allocation6], 0 }
   0x4   :  { %18 = vsyncpa [#allocation12], 0 }
   0x5   :  { %19 = vsyncpa [#allocation5], 0 }
   0x6   :  { %21 = vsyncpa [#allocation5 + $0x1], 0 }
   0x7   :  { %22 = vsyncpa [#allocation15], 0 }
   0x8   :  { %24 = vsyncpa [#allocation15 + $0x1], 0  ;;  %s1359_s24 = smov 0   ;;  %s1361_s25 = smov 0  }
   0x9   :  { %s1363_s26 = smov 0   ;;  %s1365_s27 = smov 0  }
   0xa LB: > { %s1380_s28 = sadd.s32 4294967295, %s1299_s27   ;;  %s877_s29 = sadd.s32 4294967294, %s1299_s27   ;;  %s1299_s27 = sphi %s1365_s27, %s1778_s27   ;;  %s1295_s26 = sphi %s1363_s26, %s1777_s26   ;;  %s1291_s25 = sphi %s1361_s25, %s1776_s25   ;;  %s1287_s24 = sphi %s1359_s24, %s1775_s24  }
   0xb   : > { %p50_p0 = scmp.ne.s32.totalorder %s1291_s25, %s1287_s24  ;;  %p1747_p1 = scmp.eq.s32.totalorder %s1380_s28, 0 }
   0xc   : > { %p185_p3 = scmp.eq.s32.totalorder %s877_s29, 1  ;;  %p878_p5 = scmp.ge.s32.totalorder %s1299_s27, 1 }
   0xd   : > { %p1389_p4 = por %p1747_p1, %p50_p0  ;;  %p218_p7 = scmp.lt.s32.totalorder %s1299_s27, 3 }
   0xe   : > { %p1394_p6 = por %p185_p3, %p50_p0  ;;  %s1301_s10 = smov [#allocation7]  }
   0xf   : > { %s1753_s30 = scalar_select %p1389_p4, 1, 0 }
  0x10   : > { %s1754_s8 = scalar_select %p1394_p6, 1, 0 }
  0x11   : > { %p1400_p9 = pnand %p878_p5, %p218_p7  ;;  %s230_s11 = sshll.u32 %s1301_s10, 4  ;;  %s1404_s11 = int_to_ptr.vmem [resolvable:$true] %s230_s11 }
  0x12   : > { %s1302_s13 = smov [#allocation9]   ;;  %s1060_s17 = scalar_lea.hbm %s1740_s1, 128 }
  0x13   : > { %s1755_s9 = scalar_select %p1400_p9, 1, 0 }
  0x14   : > { %p972_p10 = pneg %p1400_p9  ;;  %s243_s14 = sshll.u32 %s1302_s13, 4  ;;  %s1415_s14 = int_to_ptr.vmem [resolvable:$true] %s243_s14 }
  0x15   : > { %p1061_p13 = scmp.ne.s32.totalorder %s1740_s1, %s1060_s17  ;;  %p1067_p7 = scmp.lt.u32.totalorder %s1060_s17, %s1740_s1 }
  0x16   : > { %p1411_p12 = pnand %p972_p10, %p1747_p1 }
  0x18   : > { %p1425_p0 = pneg %p1411_p12 }
  0x1a   : > { %p1063_p3 = pnand %p1425_p0, %p1061_p13 }
  0x1c   : > { %p1064_p5 = pneg %p1063_p3 }
  0x1e   : > { %p1069_p10 = pnand %p1067_p7, %p1064_p5 }
  0x20   : > { %1072 = shalt.err (!%p1069_p10)
}
  0x21   : > { %s1073_s23 = scalar_lea.vmem %s1404_s11, 128  ;;  %p1081_p2 = scmp.lt.s32.totalorder %s1404_s11, %s1404_s11 }
  0x22   : > { %p1074_p11 = scmp.ne.s32.totalorder %s1404_s11, %s1073_s23  ;;  %p1082_p6 = scmp.lt.s32.totalorder %s1073_s23, %s1073_s23 }
  0x24   : > { %p1076_p8 = pnand %p1074_p11, %p1425_p0  ;;  %p1083_p13 = por %p1082_p6, %p1081_p2 }
  0x26   : > { %p1077_p1 = pneg %p1076_p8 }
  0x28   : > { %p1084_p3 = pnand %p1083_p13, %p1077_p1 }
  0x2a   : > { %1087 = shalt.err (!%p1084_p3)
}
  0x2b   : > { %s1303_s29 = smov 64   ;;  %s1304_s10 = smov 4  }
  0x2c   : > { %975 = dma.hbm_to_vmem [thread:$0]  (!%p1411_p12), %s1740_s1, 128, %s1404_s11, [#allocation8], %s1303_s29, %s1303_s29, %s1304_s10  }
  0x2d   : > { %s1088_s18 = scalar_lea.hbm %s1741_s2, 256 }
  0x2e   : > { %p1089_p1 = scmp.ne.s32.totalorder %s1741_s2, %s1088_s18  ;;  %p1095_p8 = scmp.lt.u32.totalorder %s1088_s18, %s1741_s2 }
  0x30   : > { %p1091_p2 = pnand %p1089_p1, %p1425_p0 }
  0x32   : > { %p1092_p6 = pneg %p1091_p2 }
  0x34   : > { %p1097_p11 = pnand %p1095_p8, %p1092_p6 }
  0x36   : > { %1100 = shalt.err (!%p1097_p11)
}
  0x37   : > { %s1101_s11 = scalar_lea.vmem %s1415_s14, 256  ;;  %p1109_p13 = scmp.lt.s32.totalorder %s1415_s14, %s1415_s14 }
  0x38   : > { %p1102_p5 = scmp.ne.s32.totalorder %s1415_s14, %s1101_s11  ;;  %p1110_p3 = scmp.lt.s32.totalorder %s1101_s11, %s1101_s11 }
  0x3a   : > { %p1104_p7 = pnand %p1102_p5, %p1425_p0  ;;  %p1111_p1 = por %p1110_p3, %p1109_p13 }
  0x3c   : > { %p1105_p10 = pneg %p1104_p7 }
  0x3e   : > { %p1112_p2 = pnand %p1111_p1, %p1105_p10 }
  0x40   : > { %1115 = shalt.err (!%p1112_p2)
}
  0x41   : > { %s1748_s13 = smov 128   ;;  %s1749_s15 = smov 8  }
  0x42   : > { %978 = dma.hbm_to_vmem [thread:$0]  (!%p1411_p12), %s1741_s2, 256, %s1415_s14, [#allocation8], %s1748_s13, %s1748_s13, %s1749_s15  }
  0x43   : > { %s257_s21 = sshll.u32 %s1742_s3, 4  ;;  %s258_s21 = int_to_ptr.vmem [resolvable:$true] %s257_s21 }
  0x44   : > { %s1116_s22 = scalar_lea.vmem %s258_s21, 16  ;;  %p1124_p5 = scmp.lt.s32.totalorder %s258_s21, %s258_s21 }
  0x45   : > { %p1117_p6 = scmp.ne.s32.totalorder %s258_s21, %s1116_s22  ;;  %p1125_p7 = scmp.lt.s32.totalorder %s1116_s22, %s1116_s22 }
  0x47   : > { %p1119_p8 = pnand %p1117_p6, %p1425_p0  ;;  %p1126_p10 = por %p1125_p7, %p1124_p5 }
  0x49   : > { %p1120_p11 = pneg %p1119_p8 }
  0x4b   : > { %p1127_p13 = pnand %p1126_p10, %p1120_p11 }
  0x4d   : > { %1130 = shalt.err (!%p1127_p13)
}
  0x4e   : > { %s1307_s23 = smov [#allocation10]   ;;  %s1308_s14 = smov [#allocation11]  }
  0x4f   : > { %981 = dma.vmem_to_smem (!%p1411_p12), %s258_s21, 16, %s1307_s23, [#allocation6]  }
  0x50   : > { %s267_s11 = sshll.u32 %s1308_s14, 4  ;;  %s1131_s18 = scalar_lea.hbm %s1743_s4, 256  ;;  %s268_s11 = int_to_ptr.vmem [resolvable:$true] %s267_s11 }
  0x51   : > { %p1132_p3 = scmp.ne.s32.totalorder %s1743_s4, %s1131_s18  ;;  %p1138_p6 = scmp.lt.u32.totalorder %s1131_s18, %s1743_s4 }
  0x53   : > { %p1134_p1 = pnand %p1132_p3, %p1425_p0 }
  0x55   : > { %p1135_p2 = pneg %p1134_p1 }
  0x57   : > { %p1140_p8 = pnand %p1138_p6, %p1135_p2 }
  0x59   : > { %1143 = shalt.err (!%p1140_p8)
}
  0x5a   : > { %s1144_s21 = scalar_lea.vmem %s268_s11, 256  ;;  %p1152_p10 = scmp.lt.s32.totalorder %s268_s11, %s268_s11 }
  0x5b   : > { %p1145_p11 = scmp.ne.s32.totalorder %s268_s11, %s1144_s21  ;;  %p1153_p13 = scmp.lt.s32.totalorder %s1144_s21, %s1144_s21 }
  0x5d   : > { %p1147_p5 = pnand %p1145_p11, %p1425_p0  ;;  %p1154_p4 = por %p1153_p13, %p1152_p10 }
  0x5f   : > { %p1148_p7 = pneg %p1147_p5 }
  0x61   : > { %p1155_p9 = pnand %p1154_p4, %p1148_p7 }
  0x63   : > { %1158 = shalt.err (!%p1155_p9)
}
  0x64   : > { %984 = dma.hbm_to_vmem [thread:$0]  (!%p1411_p12), %s1743_s4, 256, %s268_s11, [#allocation12], %s1303_s29, %s1303_s29, %s1304_s10  }
  0x65   : > { %s1504_s20 = sadd.s32 1, %s1299_s27   ;;  %s37_s12 = sadd.s32 1, %s1295_s26 }
  0x66   : > { %s34_s23 = ssub.s32 %s1299_s27, %s1504_s20  ;;  %p44_p4 = scmp.ne.s32.totalorder %s1295_s26, %s1291_s25 }
  0x67   : > { %p35_p9 = scmp.eq.s32.totalorder %s34_s23, 0  ;;  %p45_p0 = scmp.eq.s32.totalorder %s1299_s27, 0 }
  0x68   : > { %p1758_p3 = scmp.eq.s32.totalorder %s1380_s28, 1  ;;  %p1000_p2 = scmp.lt.s32.totalorder %s1299_s27, 2 }
  0x69   : > { %s1520_s16 = scalar_select %p35_p9, %s1295_s26, %s37_s12  }
  0x6a   : > { %p1514_p1 = por %p1758_p3, %p44_p4  ;;  %p46_p6 = por %p45_p0, %p44_p4 }
  0x6b   : > { %s284_s17 = sand.u32 1, %s1295_s26   ;;  %s916_s29 = sshll.u32 %s1299_s27, 8 }
  0x6c   : > { %s884_s18 = sshll.u32 %s284_s17, 4  ;;  %s1527_s19 = scalar_lea.hbm %s1739_s0, %s916_s29 }
  0x6d   : > { %s288_s22 = scalar_lea.vmem [#allocation3], %s884_s18  ;;  %p1531_p12 = pnand %p1000_p2, %p46_p6 }
  0x6e   : > { %s295_s21 = sshll.u32 %s288_s22, 4  ;;  %s1535_s15 = scalar_lea.sflag [#allocation4], %s284_s17  ;;  %s1529_s21 = int_to_ptr.vmem [resolvable:$true] %s295_s21 }
  0x6f   : > { %s1159_s12 = scalar_lea.hbm %s1527_s19, 256  ;;  %p1161_p11 = pneg %p1531_p12 }
  0x70   : > { %p1160_p8 = scmp.ne.s32.totalorder %s1527_s19, %s1159_s12  ;;  %s1164_s29 = scalar_lea.hbm %s1739_s0, 512 }
  0x71   : > { %p1165_p10 = scmp.lt.u32.totalorder %s1527_s19, %s1739_s0  ;;  %p1166_p13 = scmp.lt.u32.totalorder %s1164_s29, %s1159_s12 }
  0x72   : > { %p1162_p5 = pnand %p1161_p11, %p1160_p8  ;;  %p1168_p9 = scmp.lt.u32.totalorder %s1159_s12, %s1527_s19 }
  0x73   : > { %p1167_p4 = por %p1166_p13, %p1165_p10 }
  0x74   : > { %p1163_p7 = pneg %p1162_p5 }
  0x75   : > { %p1169_p0 = por %p1168_p9, %p1167_p4 }
  0x77   : > { %p1170_p3 = pnand %p1169_p0, %p1163_p7 }
  0x79   : > { %1173 = shalt.err (!%p1170_p3)
}
  0x7a   : > { %s1174_s17 = scalar_lea.vmem %s1529_s21, 256  ;;  %s1309_s22 = smov [#allocation3]  }
  0x7b   : > { %p1175_p2 = scmp.ne.s32.totalorder %s1529_s21, %s1174_s17  ;;  %s1179_s23 = sshll.u32 %s1309_s22, 4  ;;  %s1180_s23 = int_to_ptr.vmem [resolvable:$false] %s1179_s23 }
  0x7c   : > { %s1181_s18 = scalar_lea.vmem %s1180_s23, 512  ;;  %p1182_p5 = scmp.lt.s32.totalorder %s1529_s21, %s1180_s23 }
  0x7d   : > { %p1177_p6 = pnand %p1175_p2, %p1161_p11  ;;  %p1183_p10 = scmp.lt.s32.totalorder %s1181_s18, %s1174_s17 }
  0x7f   : > { %p1178_p8 = pneg %p1177_p6  ;;  %p1184_p13 = por %p1183_p10, %p1182_p5 }
  0x81   : > { %p1185_p4 = pnand %p1184_p13, %p1178_p8 }
  0x83   : > { %1188 = shalt.err (!%p1185_p4)
}
  0x84   : > { %s1761_s12 = smov 8   ;;  %s1762_s29 = smov 128  }
  0x85   : > { %988 = dma.hbm_to_vmem [thread:$0]  (!%p1531_p12), %s1527_s19, 256, %s1529_s21, %s1535_s15, %s1762_s29, %s1762_s29, %s1761_s12  }
  0x86   : > { %p1763_p11 = scmp.ne.s32.totalorder %s1755_s9, 0 }
  0x87   : > { %s1569_s10 = sand.u32 (!%p1763_p11), 1, %s1291_s25   ;;  %p1764_p7 = scmp.ne.s32.totalorder (!%p1763_p11), %s1753_s30, 0 }
  0x88   : > { %307 = sbr.rel (%p1763_p11) target bundleno = 1341 (0x53d), region = 44  ;;  %s1572_s11 = sshll.u32 (!%p1763_p11), %s1569_s10, 4 }
  0x89   : > { %s310_s13 = scalar_lea.sflag (!%p1763_p11), [#allocation4], %s1569_s10  ;;  %s313_s17 = scalar_lea.vmem (!%p1763_p11), [#allocation3], %s1572_s11 }
  0x8f   : > { %1262 = dma.done.wait (%p1764_p7), %s310_s13, 256  }
  0x90   : > { %1264 = vsyncadd (%p1764_p7), %s310_s13, 4294967040  ;;  %p1765_p12 = scmp.eq.s32.totalorder %s1380_s28, 0 }
  0x92   : > { %1266 = dma.done.wait (%p1765_p12), [#allocation8], 384   ;;  %p1766_p9 = pmov %p1765_p12 }
  0x94   : > { %1268 = vsyncadd (%p1766_p9), [#allocation8], 4294966912  ;;  %p1767_p0 = pmov %p1766_p9 }
  0x96   : > { %1270 = dma.done.wait (%p1767_p0), [#allocation6], 16   ;;  %p1768_p3 = pmov %p1767_p0 }
  0x97   : > { %p1769_p2 = pmov %p1767_p0 }
  0x98   : > { %1272 = vsyncadd (%p1768_p3), [#allocation6], 4294967280 }
  0x99   : > { %1274 = dma.done.wait (%p1769_p2), [#allocation12], 256   ;;  %p1770_p6 = pmov %p1767_p0 }
  0x9b   : > { %1276 = vsyncadd (%p1770_p6), [#allocation12], 4294967040 }
  0x9c   : > { %334 = sfence }
  0x9d   : > { %v1053_v0 = vld [vmem:[#allocation7] sm:$0xff]   ;;  %v1310_v1 = vmov 0.0   ;;  %v1595_v3 = vld [vmem:[%s313_s17 + $0x8] sm:$0xff]  ;;  %vm1311_vm0 = vmmov 0   ;;  %vm383_vm1 = vcmask 130048   ;;  %s428_s30 = sld [smem:[#allocation10]]  ;;  %v482_v41 = vlaneseq }
  0x9e   : > { %924 = vmatprep.subr.bf16.mxu0 %v1310_v1  ;;  %v1593_v2 = vld [vmem:[%s313_s17] sm:$0xff]  ;;  %926 = vmatprep.mubr.msk.bf16.mxu0 %vm1311_vm0, %v1310_v1  ;;  %v895_v5 = vld [vmem:[#allocation9 + $0x3] ss:$0 sm:$0xff]  ;;  %vm436_vm4 = vcmask 261120   ;;  %v471_v43 = vld [vmem:[#allocation9 + $0x4] sm:$0x1] }
  0x9f   : > { %925 = vmatpush3.bf16.msra.mxu0 %v1053_v0  ;;  %v369_v4 = vpack.c.bf16 %v1595_v3, %v1593_v2  ;;  %v483_v42 = vshrl.u32 %v482_v41, 7  ;;  %v478_v48 = vld [vmem:[#allocation9 + $0x5] sm:$0x1]  ;;  %s1611_s29 = scalar_lea.vmem [#allocation13], %s1572_s11  ;;  %s1614_s13 = scalar_lea.vmem [#allocation14], %s1572_s11 }
  0xa0   : > { %p1771_p8 = scmp.ne.s32.totalorder %s1380_s28, 0 }
  0xa1   : > { %v1606_v44 = vsub.s32 0, %v483_v42  ;;  %vm498_vm5 = vcmask (!%p1771_p8), 254976   ;;  %v1312_v57 = vmov (!%p1771_p8), 0.0  }
  0xa2   : > { %927 = vmatmul.mubr.msk.bf16.vlgmr.msra.gmra.mrb[0].mxu0 %vm383_vm1, %v369_v4  ;;  %499 = vst.msk [vmem:[#allocation2] sm:$0x3] (!%p1771_p8), %vm498_vm5, %v1312_v57  ;;  %500 = vst.msk [vmem:[#allocation2 + $0x12] sm:$0x3] (!%p1771_p8), %vm498_vm5, %v1312_v57 }
  0xa3   : > { %v431_v7 = vstv %s428_s30 }
 0x175   : > { %v421_v6 = vpop.f32.mrb[0].mxu0 }
 0x176   : > { %v422_v8 = vadd.f32 %v895_v5, %v421_v6  ;;  %v928_v9 = vpop.f32.mrb[1].mxu0 }
 0x177   : > { %v424_v10 = vpop.f32.mrb[2].mxu0 }
 0x178   : > { %vm429_vm2 = vcmp.ge.f32.partialorder %v422_v8, 0.0  ;;  %v432_v11 = vmul.f32 %v431_v7, %v422_v8  ;;  %v425_v12 = vadd.f32 %v895_v5, %v424_v10  ;;  %v929_v13 = vpop.f32.mrb[3].mxu0 }
 0x17a   : > { %vm430_vm3 = vcmp.ge.f32.partialorder %v425_v12, 0.0  ;;  %v433_v14 = vmul.f32 %v431_v7, %v425_v12  ;;  %v434_v15 = vsel %vm429_vm2, %v422_v8, %v432_v11 }
 0x17b   : > { %v437_v17 = vsel %vm436_vm4, %v434_v15, 0.0  ;;  %v449_v19 = vmul.f32 %v434_v15, %v434_v15 }
 0x17c   : > { %v435_v16 = vsel %vm430_vm3, %v425_v12, %v433_v14 }
 0x17d   : > { %v438_v18 = vsel %vm436_vm4, %v435_v16, 0.0  ;;  %v450_v20 = vmul.f32 %v435_v16, %v435_v16  ;;  %v451_v23 = vsel %vm436_vm4, %v449_v19, 0.0 }
 0x17e   : > { %v439_v21 = vadd.f32 %v438_v18, %v437_v17 }
 0x17f   : > { %v452_v22 = vsel %vm436_vm4, %v450_v20, 0.0 }
 0x180   : > { %440 = vadd.xlane.f32.xlu0 %v439_v21  ;;  %v453_v24 = vadd.f32 %v452_v22, %v451_v23 }
 0x184   : > { %454 = vadd.xlane.f32.xlu0 %v453_v24 }
 0x20d   : > { %v441_v25 = vpop.xlane.xlu0 %440 }
 0x20e   : > { %v442_v26 = vrot.slane %v441_v25, 4 }
 0x210   : > { %v443_v27 = vadd.f32 %v442_v26, %v441_v25 }
 0x211   : > { %v455_v28 = vpop.xlane.xlu0 %454 }
 0x212   : > { %v444_v29 = vrot.slane %v443_v27, 2  ;;  %v456_v30 = vrot.slane %v455_v28, 4 }
 0x214   : > { %v457_v31 = vadd.f32 %v456_v30, %v455_v28  ;;  %v445_v32 = vadd.f32 %v444_v29, %v443_v27 }
 0x216   : > { %v458_v33 = vrot.slane %v457_v31, 2  ;;  %v446_v34 = vrot.slane %v445_v32, 1 }
 0x218   : > { %v459_v35 = vadd.f32 %v458_v33, %v457_v31  ;;  %v447_v36 = vadd.f32 %v446_v34, %v445_v32 }
 0x21a   : > { %938 = vpush %v447_v36  ;;  %v460_v37 = vrot.slane %v459_v35, 1 }
 0x21c   : > { %v461_v38 = vadd.f32 %v460_v37, %v459_v35 }
 0x21e   : > { %940 = vpush %v461_v38 }
 0x24b   : > { %s939_s9 = spop %938 }
 0x24c   : > { %s465_s19 = smul.f32 0.001953125, %s939_s9 }
 0x24e   : > { %s469_s21 = smul.f32 %s465_s19, %s465_s19  ;;  %v479_v47 = vstv %s465_s19 }
 0x24f   : > { %s941_s15 = spop %940 }
 0x250   : > { %s468_s22 = smul.f32 0.001953125, %s941_s15 }
 0x252   : > { %s470_s23 = ssub.f32 %s468_s22, %s469_s21 }
 0x254   : > { %s472_s18 = sadd.f32 1e-05, %s470_s23 }
 0x256   : > { %v473_v39 = vstv %s472_s18 }
 0x257   : > { %1054 = vrsqrt.f32 %v473_v39 }
 0x261   : > { %v1055_v40 = vpop.eup %1054 }
 0x262   : > { %942 = vpush %v1055_v40 }
 0x293   : > { %s943_s12 = spop %942 }
 0x294   : > { %v476_v45 = vstv %s943_s12 }
 0x295   : > { %v477_v46 = vmul.f32 %v476_v45, %v471_v43 }
 0x297   : > { %v480_v49 = vmul.f32 %v479_v47, %v477_v46  ;;  %v485_v50 = vrot.slane %v477_v46, %v1606_v44  ;;  %497 = sbr.rel (%p1771_p8) target bundleno = 670 (0x29e), region = 68 }
 0x299   : > { %v481_v51 = vsub.f32 %v478_v48, %v480_v49  ;;  %v486_v52 = vmul.f32 %v485_v50, %v434_v15  ;;  %v487_v53 = vmul.f32 %v485_v50, %v435_v16 }
 0x29b   : > { %v491_v54 = vrot.slane %v481_v51, %v1606_v44 }
 0x29d   : > { %v492_v55 = vadd.f32 %v491_v54, %v486_v52  ;;  %v493_v56 = vadd.f32 %v491_v54, %v487_v53 }
 0x29e PF: > { %930 = vmatprep.subr.bf16.mxu1 %v1310_v1  ;;  %934 = vmatprep.mubr.msk.bf16.mxu1 %vm1311_vm0, %v1310_v1  ;;  %v899_v58 = vld [vmem:[#allocation9] ss:$0 sm:$0xff]  ;;  %v900_v59 = vld [vmem:[#allocation9 + $0x1] ss:$0 sm:$0xff]  ;;  %s903_s11 = sld [smem:[#allocation10 + $0x1]]  ;;  %v1056_v45 = vld [vmem:[#allocation11] sm:$0xff]  }
 0x29f   : > { %501 = vst.msk [vmem:[#allocation2 + $0x2] sm:$0xff] %vm436_vm4, %v492_v55  ;;  %502 = vst.msk [vmem:[#allocation2 + $0xa] sm:$0xff] %vm436_vm4, %v493_v56  ;;  %v901_v60 = vld [vmem:[#allocation9 + $0x2] ss:$0 sm:$0xff]  ;;  %v902_v14 = vld [vmem:[#allocation9 + $0x6] ss:$0 sm:$0xff]  ;;  %931 = vmatpush3.bf16.msra.mxu1 %v1056_v45 }
 0x2a0   : > { %932 = vmatprep.subr.bf16.mxu1 %v1310_v1  ;;  %v1057_v47 = vld [vmem:[#allocation11 + $0x8] sm:$0xff]   ;;  %s1313_s17 = smov 16   ;;  %v583_v1 = vld [vmem:[#allocation9 + $0x7] sm:$0x1]  ;;  %v590_v53 = vld [vmem:[#allocation9 + $0x8] sm:$0x1] }
 0x2a1   : > { %678 = vrot.lane.b32.xlu1 %v1593_v2, %s1313_s17 }
 0x2a3   : > { %933 = vmatpush3.bf16.msra.mxu1 %v1057_v47 }
 0x2a4   : > { %v544_v17 = vstv %s903_s11 }
 0x2a5   : > { %680 = vrot.lane.b32.xlu1 %v1595_v3, %s1313_s17  ;;  %s1752_s17 = sshll.u32 %s1380_s28, 8 }
 0x2a6   : > { %v503_v61 = vld [vmem:[#allocation2] sm:$0xff]  ;;  %v504_v62 = vld [vmem:[#allocation2 + $0x8] sm:$0xff] }
 0x2a7   : > { %v512_v63 = vld [vmem:[#allocation2 + $0x2] sm:$0xff]  ;;  %v510_v0 = vmul.f32 %v899_v58, %v503_v61  ;;  %v511_v4 = vmul.f32 %v899_v58, %v504_v62  ;;  %v513_v5 = vld [vmem:[#allocation2 + $0xa] sm:$0xff] }
 0x2a8   : > { %v519_v6 = vmul.f32 %v900_v59, %v512_v63  ;;  %v523_v7 = vld [vmem:[#allocation2 + $0x4] sm:$0xff]  ;;  %v524_v8 = vld [vmem:[#allocation2 + $0xc] sm:$0xff]  ;;  %v520_v9 = vmul.f32 %v900_v59, %v513_v5  ;;  %v904_v63 = vld [vmem:[%s1744_s5] ss:$0 sm:$0xff] }
 0x2a9   : > { %v530_v10 = vmul.f32 %v901_v60, %v523_v7  ;;  %v531_v11 = vmul.f32 %v901_v60, %v524_v8 }
 0x2aa   : > { %v521_v12 = vadd.f32 %v519_v6, %v510_v0  ;;  %v522_v13 = vadd.f32 %v520_v9, %v511_v4 }
 0x2ac   : > { %v532_v15 = vadd.f32 %v530_v10, %v521_v12  ;;  %v533_v16 = vadd.f32 %v531_v11, %v522_v13 }
 0x2ae   : > { %v539_v18 = vadd.f32 %v902_v14, %v532_v15  ;;  %v540_v19 = vadd.f32 %v902_v14, %v533_v16 }
 0x2b0   : > { %vm542_vm6 = vcmp.ge.f32.partialorder %v539_v18, 0.0  ;;  %v545_v20 = vmul.f32 %v544_v17, %v539_v18  ;;  %vm543_vm7 = vcmp.ge.f32.partialorder %v540_v19, 0.0  ;;  %v546_v21 = vmul.f32 %v544_v17, %v540_v19 }
 0x2b2   : > { %v547_v22 = vsel %vm542_vm6, %v539_v18, %v545_v20  ;;  %v548_v23 = vsel %vm543_vm7, %v540_v19, %v546_v21 }
 0x2b3   : > { %v549_v24 = vsel %vm436_vm4, %v547_v22, 0.0  ;;  %v561_v25 = vmul.f32 %v547_v22, %v547_v22  ;;  %v550_v26 = vsel %vm436_vm4, %v548_v23, 0.0  ;;  %v562_v27 = vmul.f32 %v548_v23, %v548_v23 }
 0x2b4   : > { %v551_v28 = vadd.f32 %v550_v26, %v549_v24 }
 0x2b5   : > { %v563_v29 = vsel %vm436_vm4, %v561_v25, 0.0  ;;  %v564_v30 = vsel %vm436_vm4, %v562_v27, 0.0 }
 0x2b6   : > { %552 = vadd.xlane.f32.xlu0 %v551_v28  ;;  %v565_v31 = vadd.f32 %v564_v30, %v563_v29 }
 0x2ba   : > { %566 = vadd.xlane.f32.xlu0 %v565_v31 }
 0x313   : > { %v679_v62 = vpop.permute.xlu1 %678 }
 0x317   : > { %v681_v6 = vpop.permute.xlu1 %680 }
 0x343   : > { %v553_v32 = vpop.xlane.xlu0 %552 }
 0x344   : > { %v554_v33 = vrot.slane %v553_v32, 4 }
 0x346   : > { %v555_v34 = vadd.f32 %v554_v33, %v553_v32 }
 0x347   : > { %v567_v35 = vpop.xlane.xlu0 %566 }
 0x348   : > { %v556_v36 = vrot.slane %v555_v34, 2  ;;  %v568_v37 = vrot.slane %v567_v35, 4 }
 0x34a   : > { %v569_v38 = vadd.f32 %v568_v37, %v567_v35  ;;  %v557_v39 = vadd.f32 %v556_v36, %v555_v34 }
 0x34c   : > { %v570_v40 = vrot.slane %v569_v38, 2  ;;  %v558_v41 = vrot.slane %v557_v39, 1 }
 0x34e   : > { %v559_v42 = vadd.f32 %v558_v41, %v557_v39  ;;  %v571_v43 = vadd.f32 %v570_v40, %v569_v38 }
 0x350   : > { %944 = vpush %v559_v42  ;;  %v572_v46 = vrot.slane %v571_v43, 1 }
 0x352   : > { %v573_v48 = vadd.f32 %v572_v46, %v571_v43 }
 0x354   : > { %946 = vpush %v573_v48 }
 0x381   : > { %s945_s30 = spop %944 }
 0x382   : > { %s577_s9 = smul.f32 0.001953125, %s945_s30  ;;  %s715_s30 = sshll.u32 %s1611_s29, 4  ;;  %s1645_s30 = int_to_ptr.vmem [resolvable:$true] %s715_s30 }
 0x384   : > { %s581_s19 = smul.f32 %s577_s9, %s577_s9  ;;  %v591_v2 = vstv %s577_s9 }
 0x385   : > { %s947_s21 = spop %946 }
 0x386   : > { %s580_s15 = smul.f32 0.001953125, %s947_s21  ;;  %s1643_s21 = scalar_lea.hbm %s1745_s6, %s1752_s17 }
 0x388   : > { %s582_s22 = ssub.f32 %s580_s15, %s581_s19  ;;  %s1314_s15 = smov 112  }
 0x38a   : > { %s584_s23 = sadd.f32 1e-05, %s582_s22  ;;  %s697_s22 = scalar_lea.sflag [#allocation5], %s1569_s10 }
 0x38c   : > { %v585_v49 = vstv %s584_s23  ;;  %s1189_s23 = scalar_lea.vmem %s1645_s30, 256 }
 0x38d   : > { %1058 = vrsqrt.f32 %v585_v49  ;;  %p1190_p5 = scmp.ne.s32.totalorder %s1645_s30, %s1189_s23 }
 0x38f   : > { %p1191_p10 = pnand %p1190_p5, %p1514_p1 }
 0x391   : > { %p1192_p13 = pneg %p1191_p10 }
 0x397   : > { %v1059_v50 = vpop.eup %1058 }
 0x398   : > { %948 = vpush %v1059_v50 }
 0x3c9   : > { %s949_s18 = spop %948 }
 0x3ca   : > { %v588_v51 = vstv %s949_s18  ;;  %s1315_s18 = smov [#allocation13]  }
 0x3cb   : > { %v589_v52 = vmul.f32 %v588_v51, %v583_v1  ;;  %s1193_s12 = sshll.u32 %s1315_s18, 4  ;;  %s1194_s12 = int_to_ptr.vmem [resolvable:$false] %s1193_s12 }
 0x3cc   : > { %s1195_s11 = scalar_lea.vmem %s1194_s12, 512  ;;  %p1196_p4 = scmp.lt.s32.totalorder %s1645_s30, %s1194_s12 }
 0x3cd   : > { %v592_v3 = vmul.f32 %v591_v2, %v589_v52  ;;  %v597_v54 = vrot.slane %v589_v52, %v1606_v44  ;;  %p1197_p11 = scmp.lt.s32.totalorder %s1195_s11, %s1189_s23 }
 0x3cf   : > { %v593_v55 = vsub.f32 %v590_v53, %v592_v3  ;;  %v598_v56 = vmul.f32 %v597_v54, %v547_v22  ;;  %v599_v57 = vmul.f32 %v597_v54, %v548_v23  ;;  %p1198_p7 = por %p1197_p11, %p1196_p4 }
 0x3d1   : > { %v603_v58 = vrot.slane %v593_v55, %v1606_v44  ;;  %p1199_p12 = pnand %p1198_p7, %p1192_p13 }
 0x3d3   : > { %v604_v59 = vadd.f32 %v603_v58, %v598_v56  ;;  %v605_v60 = vadd.f32 %v603_v58, %v599_v57 }
 0x3d5   : > { %v606_v61 = vpack.c.bf16 %v605_v60, %v604_v59 }
 0x3d7   : > { %935 = vmatmul.mubr.msk.bf16.vlgmr.msra.gmra.mrb[0].mxu1 %vm436_vm4, %v606_v61 }
 0x4aa   : > { %v667_v0 = vpop.f32.mrb[0].mxu1 }
 0x4ab   : > { %v668_v4 = vadd.f32 %v904_v63, %v667_v0  ;;  %v936_v5 = vpop.f32.mrb[1].mxu1 }
 0x4ac   : > { %v670_v44 = vpop.f32.mrb[2].mxu1 }
 0x4ad   : > { %674 = vst.msk [vmem:[%s1611_s29] sm:$0xff] %vm383_vm1, %v668_v4  ;;  %v684_v7 = vadd.f32 %v679_v62, %v668_v4  ;;  %v671_v8 = vadd.f32 %v904_v63, %v670_v44  ;;  %v937_v9 = vpop.f32.mrb[3].mxu1 }
 0x4af   : > { %675 = vst.msk [vmem:[%s1611_s29 + $0x8] sm:$0xff] %vm383_vm1, %v671_v8  ;;  %v685_v10 = vadd.f32 %v681_v6, %v671_v8  ;;  %688 = vrot.lane.b32.xlu0 %v684_v7, %s1314_s15 }
 0x4b0   : > { %1202 = shalt.err (!%p1199_p12)
}
 0x4b1   : > { %s1203_s29 = scalar_lea.hbm %s1643_s21, 256  ;;  %s1207_s18 = scalar_lea.hbm %s1745_s6, 512 }
 0x4b2   : > { %p1204_p9 = scmp.ne.s32.totalorder %s1643_s21, %s1203_s29  ;;  %p1208_p2 = scmp.lt.u32.totalorder %s1643_s21, %s1745_s6 }
 0x4b3   : > { %p1209_p6 = scmp.lt.u32.totalorder %s1207_s18, %s1203_s29  ;;  %p1211_p5 = scmp.lt.u32.totalorder %s1203_s29, %s1643_s21 }
 0x4b4   : > { %p1205_p0 = pnand %p1204_p9, %p1514_p1 }
 0x4b5   : > { %p1210_p8 = por %p1209_p6, %p1208_p2 }
 0x4b6   : > { %p1206_p3 = pneg %p1205_p0 }
 0x4b7   : > { %p1212_p10 = por %p1211_p5, %p1210_p8 }
 0x4b9   : > { %p1213_p13 = pnand %p1212_p10, %p1206_p3 }
 0x4bb   : > { %1216 = shalt.err (!%p1213_p13)
}
 0x4bc   : > { %s1316_s23 = smov 128   ;;  %s1317_s11 = smov 8   ;;  %690 = vrot.lane.b32.xlu1 %v685_v10, %s1314_s15 }
 0x4bd   : > { %968 = dma.vmem_to_hbm [thread:$0]  (%p1514_p1), %s1645_s30, 256, %s1643_s21, %s697_s22, %s1316_s23, %s1316_s23, %s1317_s11  }
 0x4be   : > { %s731_s17 = sshll.u32 %s1614_s13, 4  ;;  %s1772_s29 = sshll.u32 %s1380_s28, 8  ;;  %s1690_s17 = int_to_ptr.vmem [resolvable:$true] %s731_s17 }
 0x4bf   : > { %s1688_s18 = scalar_lea.hbm %s1746_s7, %s1772_s29  ;;  %s702_s30 = scalar_lea.sflag [#allocation15], %s1569_s10 }
 0x4c0   : > { %s1217_s21 = scalar_lea.vmem %s1690_s17, 256  ;;  %s1318_s28 = smov [#allocation14]  }
 0x4c1   : > { %p1218_p4 = scmp.ne.s32.totalorder %s1690_s17, %s1217_s21  ;;  %s1221_s15 = sshll.u32 %s1318_s28, 4  ;;  %s1222_s15 = int_to_ptr.vmem [resolvable:$false] %s1221_s15 }
 0x4c2   : > { %s1223_s22 = scalar_lea.vmem %s1222_s15, 512  ;;  %p1224_p12 = scmp.lt.s32.totalorder %s1690_s17, %s1222_s15 }
 0x4c3   : > { %p1219_p11 = pnand %p1218_p4, %p1514_p1  ;;  %p1225_p9 = scmp.lt.s32.totalorder %s1223_s22, %s1217_s21 }
 0x4c5   : > { %p1220_p7 = pneg %p1219_p11  ;;  %p1226_p0 = por %p1225_p9, %p1224_p12 }
 0x4c7   : > { %p1227_p3 = pnand %p1226_p0, %p1220_p7 }
 0x521   : > { %v689_v11 = vpop.permute.xlu0 %688 }
 0x522   : > { %694 = vst.msk [vmem:[%s1614_s13] sm:$0xff] %vm383_vm1, %v689_v11 }
 0x52e   : > { %v691_v12 = vpop.permute.xlu1 %690 }
 0x52f   : > { %695 = vst.msk [vmem:[%s1614_s13 + $0x8] sm:$0xff] %vm383_vm1, %v691_v12 }
 0x530   : > { %1230 = shalt.err (!%p1227_p3)
}
 0x531   : > { %s1231_s13 = scalar_lea.hbm %s1688_s18, 256  ;;  %s1235_s9 = scalar_lea.hbm %s1746_s7, 512 }
 0x532   : > { %p1232_p2 = scmp.ne.s32.totalorder %s1688_s18, %s1231_s13  ;;  %p1236_p5 = scmp.lt.u32.totalorder %s1688_s18, %s1746_s7 }
 0x533   : > { %p1237_p10 = scmp.lt.u32.totalorder %s1235_s9, %s1231_s13  ;;  %p1239_p4 = scmp.lt.u32.totalorder %s1231_s13, %s1688_s18 }
 0x534   : > { %p1233_p6 = pnand %p1232_p2, %p1514_p1 }
 0x535   : > { %p1238_p13 = por %p1237_p10, %p1236_p5 }
 0x536   : > { %p1234_p8 = pneg %p1233_p6 }
 0x537   : > { %p1240_p11 = por %p1239_p4, %p1238_p13 }
 0x539   : > { %p1241_p7 = pnand %p1240_p11, %p1234_p8 }
 0x53b   : > { %1244 = shalt.err (!%p1241_p7)
}
 0x53c   : > { %969 = dma.vmem_to_hbm [thread:$0]  (%p1514_p1), %s1690_s17, 256, %s1688_s18, %s702_s30, %s1316_s23, %s1316_s23, %s1317_s11  }
 0x53d PF: > { %s746_s21 = sand.u32 1, %s1287_s24   ;;  %p1773_p12 = scmp.ne.s32.totalorder %s1754_s8, 0 }
 0x53e   : > { %p1774_p9 = scmp.ge.s32.totalorder %s1299_s27, 2  ;;  %s747_s15 = scalar_lea.sflag [#allocation5], %s746_s21 }
 0x540   : > { %p990_p0 = pnand %p1774_p9, %p1773_p12 }
 0x542   : > { %1278 = dma.done.wait (!%p990_p0), %s747_s15, 256  }
 0x543   : > { %1280 = vsyncadd (!%p990_p0), %s747_s15, 4294967040  ;;  %s756_s14 = scalar_lea.sflag [#allocation15], %s746_s21 }
 0x544   : > { %1282 = dma.done.wait (!%p990_p0), %s756_s14, 256  }
 0x545   : > { %1284 = vsyncadd (!%p990_p0), %s756_s14, 4294967040  ;;  %p27_p1 = scmp.ge.s32.totalorder %s1504_s20, 4   ;;  %s1775_s24 = smov %s1291_s25 }
 0x546   : > { %s1776_s25 = smov %s1295_s26  ;;  %s1777_s26 = smov %s1520_s16 }
 0x547   : > { %s1778_s27 = smov %s1504_s20  ;;  %29 = sbr.rel (!%p27_p1) target bundleno = 10 (0xa), region = 127 }
 0x54e   :  { %761 = vsyncpa [#allocation4], 1 }
 0x54f   :  { %763 = vsyncpa [#allocation4 + $0x1], 1 }
 0x550   :  { %764 = vsyncpa [#allocation8], 1 }
 0x551   :  { %765 = vsyncpa [#allocation12], 1 }
 0x552   :  { %766 = vsyncpa [#allocation5], 1 }
 0x553   :  { %768 = vsyncpa [#allocation5 + $0x1], 1 }
 0x554   :  { %769 = vsyncpa [#allocation15], 1 }
 0x555   :  { %771 = vsyncpa [#allocation15 + $0x1], 1 }
 0x556   :  { %772 = vsyncpa [#allocation6], 1 }
 0x557   :  { %774 = vsyncpa [#allocation6 + $0x1], 1 }

</bundles_post_ra>
